<compile_context>
chip_gen: v7x
topology: tpu7x:2x2x1
jax: 0.10.0
libtpu: 0.0.40
codegen_flags: <defaults>
</compile_context>

<pallas_src>
import functools

import jax
import jax.numpy as jnp
from jax.experimental import pallas as pl
from jax.experimental.pallas import tpu as pltpu


def _round_up(v, m):
    return -(-v // m) * m


def _vmem_capacity_bytes():
    try:
        return int(pltpu.get_tpu_info().vmem_capacity_bytes)
    except Exception:
        return 64 * 1024 * 1024  # conservative default (v7x physical VMEM)


def rmsnorm_reference(x, g, eps=1e-5):
    xf = x.astype(jnp.float32)
    ms = jnp.mean(xf * xf, axis=-1, keepdims=True)
    return xf * jax.lax.rsqrt(ms + eps) * g.astype(jnp.float32)


def _rmsnorm_kernel_simple(x_ref, g_ref, y_ref, *, eps):
    # x_ref: (block_rows, N)   g_ref: (1, N)   y_ref: (block_rows, N)
    x = x_ref[...].astype(jnp.float32)
    g = g_ref[...].astype(jnp.float32)
    ms = jnp.mean(x * x, axis=-1, keepdims=True)
    y_ref[...] = (x * jax.lax.rsqrt(ms + eps) * g).astype(y_ref.dtype)


def _rmsnorm_kernel_folded(x_ref, g_ref, seg_ref, y_ref, *, eps, inv_n):
    # Lane-dense small-N path: each kernel row holds `fold` logical rows of
    # length n (fold * n == lane_n).  Per-segment sum of squares via a
    # block-diagonal matmul with a resident bf16 seg matrix; 2-pass hi/lo
    # split keeps f32 accuracy with plain bf16 MXU passes.
    x = x_ref[...].astype(jnp.float32)
    g = g_ref[...].astype(jnp.float32)
    seg = seg_ref[...]                                  # (lane_n, lane_n) bf16 0/1
    sq = x * x
    hi = sq.astype(jnp.bfloat16)
    lo = (sq - hi.astype(jnp.float32)).astype(jnp.bfloat16)
    segsum = (jnp.dot(hi, seg, preferred_element_type=jnp.float32)
              + jnp.dot(lo, seg, preferred_element_type=jnp.float32))
    ms = segsum * inv_n                                 # (block_rows, lane_n)
    y_ref[...] = (x * jax.lax.rsqrt(ms + eps) * g).astype(y_ref.dtype)


def _choose_block_rows(rows, lane_n, in_bytes, out_bytes, budget):
    """Row tile: <=512 rows, fits the VMEM budget, >=~8 programs when possible."""
    # Double-buffered input + output blocks plus ~2 f32 temporaries per block.
    per_row = lane_n * (2 * in_bytes + 2 * out_bytes + 2 * 4)
    max_rows_by_vmem = max(8, budget // max(per_row, 1))
    br = min(rows, 512, int(max_rows_by_vmem))
    if br >= rows:
        if rows >= 16:
            # Whole problem fits one block: split into ~8 programs so each
            # v7x TensorCore still pipelines (prefetch i+1 / writeback i-1).
            br = _round_up(pl.cdiv(rows, 8), 8)
        else:
            return rows  # tiny: single full-extent block
    return max(8, (br // 8) * 8)


def rmsnorm_forward(x, g, eps=1e-5, block_rows=None, out_dtype=jnp.float32):
    """RMSNorm forward. x: (M, L, N), g: (N,). Returns out_dtype (M, L, N)."""
    M, L, N = x.shape
    R = M * L

    in_bytes = jnp.dtype(x.dtype).itemsize
    out_bytes = jnp.dtype(out_dtype).itemsize

    # Lane-dense folding for small hidden dims (only when it needs no padding).
    fold = 1
    if N < 128 and 128 % N == 0 and R % (128 // N) == 0:
        fold = 128 // N
    lane_n = fold * N
    rows = R // fold

    capacity = _vmem_capacity_bytes()
    budget = int(0.4 * capacity)

    min_block_bytes = 8 * lane_n * (2 * in_bytes + 2 * out_bytes + 2 * 4)
    if min_block_bytes > budget:
        # TODO(synk): column-tiled two-pass Pallas path for extreme hidden
        # dims; fall back to plain XLA so we degrade gracefully.
        return rmsnorm_reference(x, g, eps).astype(out_dtype)

    if block_rows is None:
        block_rows = _choose_block_rows(rows, lane_n, in_bytes, out_bytes, budget)
    block_rows = min(block_rows, rows)
    if block_rows < rows:
        block_rows = max(8, (block_rows // 8) * 8)

    # Free reshapes (row-major, no data movement, no padding).
    xk = x.reshape(rows, lane_n)
    gk = (jnp.tile(g, fold) if fold > 1 else g).reshape(1, lane_n)

    grid = (pl.cdiv(rows, block_rows),)

    in_specs = [
        pl.BlockSpec((block_rows, lane_n), lambda i: (i, 0)),  # x rows (streamed)
        pl.BlockSpec((1, lane_n), lambda i: (0, 0)),           # g (VMEM-resident)
    ]
    args = [xk, gk]
    if fold > 1:
        seg_idx = jnp.arange(lane_n, dtype=jnp.int32) // N
        seg = (seg_idx[:, None] == seg_idx[None, :]).astype(jnp.bfloat16)
        in_specs.append(pl.BlockSpec((lane_n, lane_n), lambda i: (0, 0)))  # resident
        args.append(seg)
        kernel = functools.partial(_rmsnorm_kernel_folded, eps=eps, inv_n=1.0 / N)
    else:
        kernel = functools.partial(_rmsnorm_kernel_simple, eps=eps)

    block_elems = block_rows * lane_n
    need = (block_elems * (2 * in_bytes + 2 * out_bytes + 2 * 4)
            + (lane_n * lane_n * 2 if fold > 1 else 0)
            + lane_n * 4)
    vmem_limit = int(min(capacity, max(32 << 20, need + (8 << 20))))

    cost = pl.CostEstimate(
        flops=4 * R * N,
        transcendentals=R,
        bytes_accessed=R * N * (in_bytes + out_bytes) + N * 4,
    )

    yk = pl.pallas_call(
        kernel,
        out_shape=jax.ShapeDtypeStruct((rows, lane_n), out_dtype),
        grid_spec=pltpu.PrefetchScalarGridSpec(
            num_scalar_prefetch=0,
            grid=grid,
            in_specs=in_specs,
            out_specs=pl.BlockSpec((block_rows, lane_n), lambda i: (i, 0)),
        ),
        compiler_params=pltpu.CompilerParams(
            dimension_semantics=("parallel",),
            vmem_limit_bytes=vmem_limit,
        ),
        cost_estimate=cost,
    )(*args)

    return yk.reshape(M, L, N)


if __name__ == "__main__":
    key = jax.random.PRNGKey(0)
    k1, k2, k3, k4, k5, k6 = jax.random.split(key, 6)

    # Case 1: small (M, L, N) with small N=32 — exercises the lane-dense fold
    # path (rows = 8, single full-extent block).
    M, L, N = 2, 16, 32
    x = jax.random.normal(k1, (M, L, N), dtype=jnp.float32)
    g = jax.random.normal(k2, (N,), dtype=jnp.float32)
    y = jax.block_until_ready(rmsnorm_forward(x, g, eps=1e-5))
    y_ref = rmsnorm_reference(x, g, eps=1e-5)
    assert y.shape == (M, L, N) and y.dtype == jnp.float32
    assert jnp.allclose(y, y_ref, atol=1e-4, rtol=1e-4)

    # Case 2: N >= 128 path with a multi-program grid.
    M2, L2, N2 = 2, 64, 256
    x2 = jax.random.normal(k3, (M2, L2, N2), dtype=jnp.float32)
    g2 = jax.random.normal(k4, (N2,), dtype=jnp.float32)
    y2 = jax.block_until_ready(rmsnorm_forward(x2, g2, eps=1e-5))
    y2_ref = rmsnorm_reference(x2, g2, eps=1e-5)
    assert y2.shape == (M2, L2, N2) and y2.dtype == jnp.float32
    assert jnp.allclose(y2, y2_ref, atol=1e-4, rtol=1e-4)

    # Case 3: bf16 input with opt-in bf16 output (halves HBM write traffic);
    # internal math stays f32.
    M3, L3, N3 = 2, 8, 128
    x3 = jax.random.normal(k5, (M3, L3, N3), dtype=jnp.bfloat16)
    g3 = jax.random.normal(k6, (N3,), dtype=jnp.float32)
    y3 = jax.block_until_ready(
        rmsnorm_forward(x3, g3, eps=1e-5, out_dtype=jnp.bfloat16))
    y3_ref = rmsnorm_reference(x3, g3, eps=1e-5)
    assert y3.shape == (M3, L3, N3) and y3.dtype == jnp.bfloat16
    assert jnp.allclose(y3.astype(jnp.float32), y3_ref, atol=3e-2, rtol=3e-2)

    print("KERNEL_OK")
</pallas_src>

<mosaic_0001>
module attributes {stable_mosaic.version = 11 : i64} {
  func.func @_rmsnorm_kernel_folded(%arg0: i32, %arg1: memref<8x128xf32, #tpu.memory_space<vmem>>, %arg2: memref<1x128xf32, #tpu.memory_space<vmem>>, %arg3: memref<128x128xbf16, #tpu.memory_space<vmem>>, %arg4: memref<8x128xf32, #tpu.memory_space<vmem>>) attributes {dimension_semantics = [#tpu.dimension_semantics<parallel>], iteration_bounds = array<i64: 1>, scalar_prefetch = 0 : i64, scratch_operands = 0 : i64, tpu.core_type = #tpu.core_type<tc>, window_params = [{transform_indices = @transform_0, window_bounds = array<i64: 8, 128>}, {pipeline_mode = #tpu.pipeline_mode<synchronous>, transform_indices = @transform_1, window_bounds = array<i64: 1, 128>}, {pipeline_mode = #tpu.pipeline_mode<synchronous>, transform_indices = @transform_2, window_bounds = array<i64: 128, 128>}, {transform_indices = @transform_3, window_bounds = array<i64: 8, 128>}]} {
    %c0 = arith.constant 0 : index
    %c0_0 = arith.constant 0 : index
    %0 = vector.load %arg1[%c0, %c0_0] : memref<8x128xf32, #tpu.memory_space<vmem>>, vector<8x128xf32>
    %c0_1 = arith.constant 0 : index
    %c0_2 = arith.constant 0 : index
    %1 = vector.load %arg2[%c0_1, %c0_2] : memref<1x128xf32, #tpu.memory_space<vmem>>, vector<1x128xf32>
    %c0_3 = arith.constant 0 : index
    %c0_4 = arith.constant 0 : index
    %2 = vector.load %arg3[%c0_3, %c0_4] : memref<128x128xbf16, #tpu.memory_space<vmem>>, vector<128x128xbf16>
    %3 = arith.mulf %0, %0 : vector<8x128xf32>
    %4 = arith.truncf %3 : vector<8x128xf32> to vector<8x128xbf16>
    %5 = arith.extf %4 : vector<8x128xbf16> to vector<8x128xf32>
    %6 = arith.subf %3, %5 : vector<8x128xf32>
    %7 = arith.truncf %6 : vector<8x128xf32> to vector<8x128xbf16>
    %cst = arith.constant dense<0.000000e+00> : vector<8x128xf32>
    %8 = tpu.matmul %4, %2, %cst {dimension_numbers = #tpu.dot_dimension_numbers<[1], [0], [0], [1], [0, 0, 1, 1], [], []>} : vector<8x128xbf16>, vector<128x128xbf16>, vector<8x128xf32> -> vector<8x128xf32>
    %cst_5 = arith.constant dense<0.000000e+00> : vector<8x128xf32>
    %9 = tpu.matmul %7, %2, %cst_5 {dimension_numbers = #tpu.dot_dimension_numbers<[1], [0], [0], [1], [0, 0, 1, 1], [], []>} : vector<8x128xbf16>, vector<128x128xbf16>, vector<8x128xf32> -> vector<8x128xf32>
    %10 = arith.addf %8, %9 : vector<8x128xf32>
    %cst_6 = arith.constant 3.125000e-02 : f32
    %11 = vector.broadcast %cst_6 : f32 to vector<8x128xf32>
    %12 = arith.mulf %10, %11 : vector<8x128xf32>
    %cst_7 = arith.constant 9.99999974E-6 : f32
    %13 = vector.broadcast %cst_7 : f32 to vector<8x128xf32>
    %14 = arith.addf %12, %13 : vector<8x128xf32>
    %15 = math.rsqrt %14 : vector<8x128xf32>
    %16 = arith.mulf %0, %15 : vector<8x128xf32>
    %17 = vector.broadcast %1 : vector<1x128xf32> to vector<8x128xf32>
    %18 = arith.mulf %16, %17 : vector<8x128xf32>
    %c0_8 = arith.constant 0 : index
    %c0_9 = arith.constant 0 : index
    %19 = vector.load %arg4[%c0_8, %c0_9] : memref<8x128xf32, #tpu.memory_space<vmem>>, vector<8x128xf32>
    tpu.vector_store %arg4[%c0_8, %c0_9], %18 {strides = array<i32>} : memref<8x128xf32, #tpu.memory_space<vmem>>, vector<8x128xf32>,
    return
  }
  func.func @transform_0(%arg0: i32) -> (i32, i32) {
    %c0_i32 = arith.constant 0 : i32
    %c0_i32_0 = arith.constant 0 : i32
    return %arg0, %c0_i32 : i32, i32
  }
  func.func @transform_1(%arg0: i32) -> (i32, i32) {
    %c0_i32 = arith.constant 0 : i32
    %c0_i32_0 = arith.constant 0 : i32
    %c0_i32_1 = arith.constant 0 : i32
    return %c0_i32, %c0_i32_0 : i32, i32
  }
  func.func @transform_2(%arg0: i32) -> (i32, i32) {
    %c0_i32 = arith.constant 0 : i32
    %c0_i32_0 = arith.constant 0 : i32
    %c0_i32_1 = arith.constant 0 : i32
    return %c0_i32, %c0_i32_0 : i32, i32
  }
  func.func @transform_3(%arg0: i32) -> (i32, i32) {
    %c0_i32 = arith.constant 0 : i32
    %c0_i32_0 = arith.constant 0 : i32
    return %arg0, %c0_i32 : i32, i32
  }
}

</mosaic_0001>

<bundles_post_ra>
// kernel: tpu_custom_call.1
= control target key start
LH: loop header
LB: loop body
LE: loop exit
PB: predicated region body
PF: predicated region fallthrough
CT: control target
= control target key end

     0   :  { %8 = vsyncpa [#allocation3], 0  ;;  %s451_s0 = inlined_call_operand.hbm [shape: f32[8,128], index: 0, kind: input, shape index: {}]   ;;  %s452_s1 = inlined_call_operand.vmem [shape: f32[1,128], index: 1, kind: input, shape index: {}]   ;;  %s453_s2 = inlined_call_operand.hbm [shape: bf16[128,128], index: 2, kind: input, shape index: {}]   ;;  %s454_s3 = inlined_call_operand.hbm [shape: f32[8,128], index: 3, kind: output, shape index: {}]  }
   0x1   :  { %9 = vsyncpa [#allocation6], 0 }
   0x2   :  { %10 = vsyncpa [#allocation4], 0  ;;  %s378_s12 = smov [#allocation2]   ;;  %s379_s14 = smov [#allocation5]  }
   0x3   :  { %s17_s13 = sshll.u32 %s378_s12, 4  ;;  %s28_s15 = sshll.u32 %s379_s14, 4  ;;  %s18_s13 = int_to_ptr.vmem [resolvable:$true] %s17_s13  ;;  %s405_s15 = int_to_ptr.vmem [resolvable:$true] %s28_s15 }
   0x4   :  { %s306_s18 = scalar_lea.hbm %s451_s0, 128 }
   0x5   :  { %p307_p0 = scmp.ne.s32.totalorder %s451_s0, %s306_s18  ;;  %p310_p1 = scmp.lt.u32.totalorder %s306_s18, %s451_s0 }
   0x7   :  { %p312_p2 = pnand %p310_p1, %p307_p0 }
   0x9   :  { %315 = shalt.err (!%p312_p2)
}
   0xa   :  { %s316_s23 = scalar_lea.vmem %s18_s13, 128  ;;  %p321_p4 = scmp.lt.s32.totalorder %s18_s13, %s18_s13 }
   0xb   :  { %p317_p3 = scmp.ne.s32.totalorder %s18_s13, %s316_s23  ;;  %p322_p5 = scmp.lt.s32.totalorder %s316_s23, %s316_s23 }
   0xd   :  { %p323_p6 = por %p322_p5, %p321_p4 }
   0xf   :  { %p324_p7 = pnand %p323_p6, %p317_p3 }
  0x11   :  { %327 = shalt.err (!%p324_p7)
}
  0x12   :  { %20 = dma.hbm_to_vmem [thread:$0]  %s451_s0, 128, %s18_s13, [#allocation3]  }
  0x13   :  { %s328_s28 = scalar_lea.hbm %s453_s2, 1024 }
  0x14   :  { %p329_p8 = scmp.ne.s32.totalorder %s453_s2, %s328_s28  ;;  %p332_p9 = scmp.lt.u32.totalorder %s328_s28, %s453_s2 }
  0x16   :  { %p334_p10 = pnand %p332_p9, %p329_p8 }
  0x18   :  { %337 = shalt.err (!%p334_p10)
}
  0x19   :  { %s338_s6 = scalar_lea.vmem %s405_s15, 1024  ;;  %p343_p12 = scmp.lt.s32.totalorder %s405_s15, %s405_s15 }
  0x1a   :  { %p339_p11 = scmp.ne.s32.totalorder %s405_s15, %s338_s6  ;;  %p344_p13 = scmp.lt.s32.totalorder %s338_s6, %s338_s6 }
  0x1c   :  { %p345_p0 = por %p344_p13, %p343_p12 }
  0x1e   :  { %p346_p1 = pnand %p345_p0, %p339_p11 }
  0x20   :  { %349 = shalt.err (!%p346_p1)
}
  0x21   :  { %s380_s0 = smov 64   ;;  %s381_s7 = smov 4  }
  0x22   :  { %34 = dma.hbm_to_vmem [thread:$0]  %s453_s2, 1024, %s405_s15, [#allocation6], %s380_s0, %s380_s0, %s381_s7  }
  0x23   :  { %372 = dma.done.wait [#allocation3], 128  }
  0x24   :  { %373 = vsyncadd [#allocation3], 4294967168 }
  0x25   :  { %374 = dma.done.wait [#allocation6], 1024  }
  0x26   :  { %375 = vsyncadd [#allocation6], 4294966272  ;;  %v382_v0 = vmov 0.0   ;;  %vm383_vm0 = vmmov 0   ;;  %v296_v1 = vld [vmem:[#allocation5] sm:$0xff]   ;;  %v297_v2 = vld [vmem:[#allocation5 + $0x8] sm:$0xff]  }
  0x27   :  { %248 = vmatprep.subr.bf16.mxu1 %v382_v0  ;;  %268 = vmatprep.subr.bf16.mxu0 %v382_v0  ;;  %v298_v3 = vld [vmem:[#allocation5 + $0x10] sm:$0xff]   ;;  %v299_v4 = vld [vmem:[#allocation5 + $0x18] sm:$0xff]   ;;  %v300_v7 = vld [vmem:[#allocation5 + $0x20] sm:$0xff]   ;;  %s384_s11 = smov [#allocation7]  }
  0x28   :  { %264 = vmatprep.mubr.msk.bf16.mxu1 %vm383_vm0, %v382_v0  ;;  %284 = vmatprep.mubr.msk.bf16.mxu0 %vm383_vm0, %v382_v0  ;;  %v42_v5 = vld [vmem:[#allocation2] sm:$0xff]  ;;  %v301_v9 = vld [vmem:[#allocation5 + $0x28] sm:$0xff]   ;;  %v302_v11 = vld [vmem:[#allocation5 + $0x30] sm:$0xff]   ;;  %s211_s12 = sshll.u32 %s384_s11, 4  ;;  %s212_s12 = int_to_ptr.vmem [resolvable:$true] %s211_s12 }
  0x29   :  { %249 = vmatpush3.bf16.msra.mxu1 %v296_v1  ;;  %269 = vmatpush3.bf16.msra.mxu0 %v296_v1  ;;  %v60_v6 = vmul.f32 %v42_v5, %v42_v5  ;;  %v303_v13 = vld [vmem:[#allocation5 + $0x38] sm:$0xff]   ;;  %s350_s13 = scalar_lea.vmem %s212_s12, 128  ;;  %p355_p3 = scmp.lt.s32.totalorder %s212_s12, %s212_s12 }
  0x2a   :  { %250 = vmatprep.subr.bf16.mxu1 %v382_v0  ;;  %270 = vmatprep.subr.bf16.mxu0 %v382_v0  ;;  %v229_v27 = vld [vmem:[%s452_s1] ss:$0 sm:$0xff]  ;;  %p351_p2 = scmp.ne.s32.totalorder %s212_s12, %s350_s13  ;;  %p356_p4 = scmp.lt.s32.totalorder %s350_s13, %s350_s13 }
  0x2b   :  { %v61_v8 = vpack.c.bf16 %v60_v6, %v60_v6 }
  0x2c   :  { %p357_p5 = por %p356_p4, %p355_p3 }
  0x2d   :  { %251 = vmatpush3.bf16.msra.mxu1 %v297_v2  ;;  %271 = vmatpush3.bf16.msra.mxu0 %v297_v2  ;;  %v62_v10 = vunpack.c.l.bf16 %v61_v8 }
  0x2e   :  { %252 = vmatprep.subr.bf16.mxu1 %v382_v0  ;;  %272 = vmatprep.subr.bf16.mxu0 %v382_v0  ;;  %p358_p6 = pnand %p357_p5, %p351_p2 }
  0x2f   :  { %v63_v12 = vsub.f32 %v60_v6, %v62_v10 }
  0x31   :  { %253 = vmatpush3.bf16.msra.mxu1 %v298_v3  ;;  %273 = vmatpush3.bf16.msra.mxu0 %v298_v3  ;;  %v64_v14 = vpack.c.bf16 %v63_v12, %v63_v12 }
  0x32   :  { %254 = vmatprep.subr.bf16.mxu1 %v382_v0  ;;  %274 = vmatprep.subr.bf16.mxu0 %v382_v0 }
  0x35   :  { %255 = vmatpush3.bf16.msra.mxu1 %v299_v4  ;;  %275 = vmatpush3.bf16.msra.mxu0 %v299_v4 }
  0x36   :  { %256 = vmatprep.subr.bf16.mxu1 %v382_v0  ;;  %276 = vmatprep.subr.bf16.mxu0 %v382_v0 }
  0x39   :  { %257 = vmatpush3.bf16.msra.mxu1 %v300_v7  ;;  %277 = vmatpush3.bf16.msra.mxu0 %v300_v7 }
  0x3a   :  { %258 = vmatprep.subr.bf16.mxu1 %v382_v0  ;;  %278 = vmatprep.subr.bf16.mxu0 %v382_v0 }
  0x3d   :  { %259 = vmatpush3.bf16.msra.mxu1 %v301_v9  ;;  %279 = vmatpush3.bf16.msra.mxu0 %v301_v9 }
  0x3e   :  { %260 = vmatprep.subr.bf16.mxu1 %v382_v0  ;;  %280 = vmatprep.subr.bf16.mxu0 %v382_v0 }
  0x41   :  { %261 = vmatpush3.bf16.msra.mxu1 %v302_v11  ;;  %281 = vmatpush3.bf16.msra.mxu0 %v302_v11 }
  0x42   :  { %262 = vmatprep.subr.bf16.mxu1 %v382_v0  ;;  %282 = vmatprep.subr.bf16.mxu0 %v382_v0 }
  0x45   :  { %263 = vmatpush3.bf16.msra.mxu1 %v303_v13  ;;  %283 = vmatpush3.bf16.msra.mxu0 %v303_v13 }
  0x48   :  { %265 = vmatmul.mubr.bf16.vlgmr.msra.gmra.mrb[0].mxu1 %v64_v14  ;;  %285 = vmatmul.mubr.bf16.vlgmr.msra.gmra.mrb[0].mxu0 %v61_v8 }
 0x11b   :  { %v147_v15 = vpop.f32.mrb[0].mxu1  ;;  %v187_v16 = vpop.f32.mrb[0].mxu0 }
 0x11c   :  { %v188_v17 = vadd.f32 %v187_v16, %v147_v15  ;;  %v266_v18 = vpop.f32.mrb[1].mxu1  ;;  %v286_v19 = vpop.f32.mrb[1].mxu0 }
 0x11d   :  { %v150_v20 = vpop.f32.mrb[2].mxu1  ;;  %v190_v21 = vpop.f32.mrb[2].mxu0 }
 0x11e   :  { %v193_v22 = vmul.f32 0.03125, %v188_v17  ;;  %v267_v23 = vpop.f32.mrb[3].mxu1  ;;  %v287_v24 = vpop.f32.mrb[3].mxu0 }
 0x120   :  { %v194_v25 = vadd.f32 1e-05, %v193_v22 }
 0x122   :  { %304 = vrsqrt.f32 %v194_v25 }
 0x12c   :  { %v305_v26 = vpop.eup %304 }
 0x12d   :  { %v196_v28 = vmul.f32 %v305_v26, %v42_v5 }
 0x12f   :  { %v203_v29 = vmul.f32 %v229_v27, %v196_v28 }
 0x131   :  { %204 = vst [vmem:[#allocation7] sm:$0xff] %v203_v29 }
 0x132   :  { %361 = shalt.err (!%p358_p6)
}
 0x133   :  { %s362_s16 = scalar_lea.hbm %s454_s3, 128 }
 0x134   :  { %p363_p7 = scmp.ne.s32.totalorder %s454_s3, %s362_s16  ;;  %p366_p8 = scmp.lt.u32.totalorder %s362_s16, %s454_s3 }
 0x136   :  { %p368_p9 = pnand %p366_p8, %p363_p7 }
 0x138   :  { %371 = shalt.err (!%p368_p9)
}
 0x139   :  { %214 = dma.vmem_to_hbm [thread:$0]  %s212_s12, 128, %s454_s3, [#allocation4]  }
 0x13a   :  { %376 = dma.done.wait [#allocation4], 128  }
 0x13b   :  { %377 = vsyncadd [#allocation4], 4294967168 }
 0x13c   :  { %218 = vsyncpa [#allocation3], 1 }
 0x13d   :  { %219 = vsyncpa [#allocation6], 1 }
 0x13e   :  { %220 = vsyncpa [#allocation4], 1 }

</bundles_post_ra>
